<compile_context>
chip_gen: v5e
topology: v5e:2x2
jax: 0.10.0
libtpu: 0.0.40
codegen_flags: <defaults>
</compile_context>

<pallas_src>
import functools

import numpy as np
import jax
import jax.numpy as jnp
from jax import lax
from jax.experimental import pallas as pl
from jax.experimental.pallas import tpu as pltpu


# ------------------------------- Pallas kernel -------------------------------

def injection_kernel(xl_ref, xg_ref, wl_ref, bl_ref, wga_ref, bga_ref, mt_ref,
                     o_ref, *, oup):
    # xl_ref : (Cin, B*H*W)      bf16   local input, batch folded into lanes
    # xg_ref : (Cin, B*Hg*Wg)    bf16   global input, batch folded into lanes
    # wl_ref : (oup, Cin)        bf16   local_embedding conv (+BN folded)
    # bl_ref : (oup, 1)          f32
    # wga_ref: (2*oup, Cin)      bf16   [global_act ; global_embedding] stacked
    # bga_ref: (2*oup, 1)        f32
    # mt_ref : (B*Hg*Wg, B*H*W)  bf16   block-diagonal separable bilinear-resize matrix
    # o_ref  : (oup, B*H*W)      f32

    # local branch: 1x1 conv (+BN) -> ReLU        (bf16 MXU, f32 accumulate)
    local = jnp.dot(wl_ref[...], xl_ref[...], preferred_element_type=jnp.float32)
    local = jnp.maximum(local + bl_ref[...], 0.0)

    # fused global branch: ONE matmul for global_act + global_embedding (shared RHS x_g)
    g = jnp.dot(wga_ref[...], xg_ref[...], preferred_element_type=jnp.float32)
    g = g + bga_ref[...]

    # rows [0, oup)      -> h_sigmoid  (global_act)
    # rows [oup, 2*oup)  -> ReLU       (global_embedding)
    row = lax.broadcasted_iota(jnp.int32, g.shape, 0)
    hsig = jnp.clip(g + 3.0, 0.0, 6.0) * (1.0 / 6.0)
    relu = jnp.maximum(g, 0.0)
    g_act_feat = jnp.where(row < oup, hsig, relu)

    # ONE bilinear-resize matmul for both global tensors (big RHS pushed once)
    g_up = jnp.dot(g_act_feat.astype(mt_ref.dtype), mt_ref[...],
                   preferred_element_type=jnp.float32)

    # out = local_feat * global_act + global_feat   (f32 epilogue, lane-dense store)
    o_ref[...] = (local * g_up[:oup] + g_up[oup:]).astype(o_ref.dtype)


# ------------------------------ host-side helpers -----------------------------

def build_resize_matrix(H, W, Hg, Wg, B):
    """Host-side (numpy, built once) per-batch block-diagonal separable bilinear
    resize matrix matching F.interpolate(mode='bilinear', align_corners=False)."""
    def axis_matrix(out_size, in_size):
        scale = in_size / out_size
        src = (np.arange(out_size, dtype=np.float64) + 0.5) * scale - 0.5
        src = np.maximum(src, 0.0)
        i0 = np.minimum(np.floor(src).astype(np.int64), in_size - 1)
        i1 = np.minimum(i0 + 1, in_size - 1)
        l1 = src - i0
        R = np.zeros((out_size, in_size), np.float64)
        R[np.arange(out_size), i0] += 1.0 - l1
        R[np.arange(out_size), i1] += l1
        return R

    Rh = axis_matrix(H, Hg)                      # (H, Hg)
    Rw = axis_matrix(W, Wg)                      # (W, Wg)
    # mt[hg*Wg + wg, h*W + w] = Rh[h, hg] * Rw[w, wg]
    mt = np.einsum('hi,wj->ijhw', Rh, Rw).reshape(Hg * Wg, H * W)
    # batch folded into the lane axis -> block-diagonal per batch element
    mt_bd = np.kron(np.eye(B), mt)               # (B*Hg*Wg, B*H*W)
    return mt_bd.astype(np.float32)


def fold_bn(w, gamma, beta, mean, var, eps=1e-5):
    """Fold eval-mode BatchNorm into a bias-free 1x1 conv (weight (oup, Cin))."""
    s = gamma / jnp.sqrt(var + eps)
    return w * s[:, None], beta - mean * s


def injection_pallas(x_l, x_g, wl_f, bl_f, wa_f, ba_f, wg_f, bg_f, mt_bd):
    B, Cin, H, W = x_l.shape
    _, _, Hg, Wg = x_g.shape
    oup = wl_f.shape[0]
    HW, HWg = H * W, Hg * Wg
    out_dtype = x_l.dtype

    # Channels-first with batch folded into the (dense) lane axis: (Cin, B*spatial).
    xl2 = jnp.transpose(x_l, (1, 0, 2, 3)).reshape(Cin, B * HW).astype(jnp.bfloat16)
    xg2 = jnp.transpose(x_g, (1, 0, 2, 3)).reshape(Cin, B * HWg).astype(jnp.bfloat16)

    # Fuse global_act + global_embedding weights so x_g and the resize matrix are
    # pushed through the MXU once.
    wga = jnp.concatenate([wa_f, wg_f], axis=0).astype(jnp.bfloat16)       # (2*oup, Cin)
    bga = jnp.concatenate([ba_f, bg_f], axis=0).reshape(2 * oup, 1)        # f32 column
    wl2 = wl_f.astype(jnp.bfloat16)
    bl2 = bl_f.reshape(oup, 1)                                             # f32 column
    mt2 = mt_bd.astype(jnp.bfloat16)

    flops = (2 * oup * Cin * B * HW                    # local conv
             + 2 * (2 * oup) * Cin * B * HWg           # fused global conv
             + 2 * (2 * oup) * (B * HWg) * (B * HW)    # fused resize matmul
             + 6 * oup * B * HW)                       # epilogue
    bytes_accessed = (2 * (Cin * B * HW + Cin * B * HWg                      # bf16 inputs
                           + oup * Cin + 2 * oup * Cin                       # bf16 weights
                           + B * HWg * B * HW)                               # bf16 resize mat
                      + 4 * (3 * oup + oup * B * HW))                        # f32 bias + out

    kernel = functools.partial(injection_kernel, oup=oup)
    out = pl.pallas_call(
        kernel,
        out_shape=jax.ShapeDtypeStruct((oup, B * HW), out_dtype),
        in_specs=[pl.BlockSpec(memory_space=pltpu.MemorySpace.VMEM)] * 7,
        out_specs=pl.BlockSpec(memory_space=pltpu.MemorySpace.VMEM),
        cost_estimate=pl.CostEstimate(flops=flops, transcendentals=0,
                                      bytes_accessed=bytes_accessed),
    )(xl2, xg2, wl2, bl2, wga, bga, mt2)

    # (oup, B*H*W) -> (B, oup, H, W)  (cheap wrapper transpose, outside the kernel)
    return jnp.transpose(out.reshape(oup, B, H, W), (1, 0, 2, 3))


# ----------------------------- pure-JAX reference -----------------------------

def bilinear_upsample_ref(x, H, W):
    """Gather+lerp F.interpolate(mode='bilinear', align_corners=False) -- independent
    of the kernel's matrix formulation."""
    B, C, Hin, Win = x.shape

    def coords(out_size, in_size):
        src = (jnp.arange(out_size, dtype=jnp.float32) + 0.5) * (in_size / out_size) - 0.5
        src = jnp.maximum(src, 0.0)
        i0 = jnp.minimum(jnp.floor(src).astype(jnp.int32), in_size - 1)
        i1 = jnp.minimum(i0 + 1, in_size - 1)
        l1 = src - i0.astype(jnp.float32)
        return i0, i1, 1.0 - l1, l1

    y0, y1, wy0, wy1 = coords(H, Hin)
    x0, x1, wx0, wx1 = coords(W, Win)

    def g(a, yi, xi):
        return a[:, :, yi, :][:, :, :, xi]

    return (g(x, y0, x0) * (wy0[:, None] * wx0[None, :])
            + g(x, y0, x1) * (wy0[:, None] * wx1[None, :])
            + g(x, y1, x0) * (wy1[:, None] * wx0[None, :])
            + g(x, y1, x1) * (wy1[:, None] * wx1[None, :]))


def injection_reference(x_l, x_g, wl_f, bl_f, wa_f, ba_f, wg_f, bg_f):
    _, _, H, W = x_l.shape

    def conv1x1(x, w, b):
        y = jnp.einsum('oc,bchw->bohw', w, x, precision=lax.Precision.HIGHEST)
        return y + b.reshape(1, -1, 1, 1)

    local = jnp.maximum(conv1x1(x_l, wl_f, bl_f), 0.0)

    gact = conv1x1(x_g, wa_f, ba_f)
    gact = jnp.clip(gact + 3.0, 0.0, 6.0) / 6.0            # h_sigmoid
    gact = bilinear_upsample_ref(gact, H, W)

    gfeat = jnp.maximum(conv1x1(x_g, wg_f, bg_f), 0.0)
    gfeat = bilinear_upsample_ref(gfeat, H, W)

    return local * gact + gfeat


# ------------------------------------ main ------------------------------------

if __name__ == "__main__":
    B, Cin, oup = 2, 8, 16
    H, W = 16, 16          # local (high-res) spatial size
    Hg, Wg = 8, 8          # global (low-res) spatial size

    keys = jax.random.split(jax.random.PRNGKey(0), 17)

    def bn_params(k0, k1, k2, k3, c):
        gamma = jax.random.uniform(k0, (c,), jnp.float32, 0.5, 1.5)
        beta = jax.random.normal(k1, (c,), jnp.float32) * 0.1
        mean = jax.random.normal(k2, (c,), jnp.float32) * 0.1
        var = jax.random.uniform(k3, (c,), jnp.float32, 0.5, 1.5)
        return gamma, beta, mean, var

    # three bias-free 1x1 convs (channels-first weight (oup, Cin)) + BN params
    wl = jax.random.normal(keys[0], (oup, Cin), jnp.float32) * 0.2
    wa = jax.random.normal(keys[1], (oup, Cin), jnp.float32) * 0.2
    wg = jax.random.normal(keys[2], (oup, Cin), jnp.float32) * 0.2
    gl, betal, ml, vl = bn_params(keys[3], keys[4], keys[5], keys[6], oup)
    ga, betaa, ma, va = bn_params(keys[7], keys[8], keys[9], keys[10], oup)
    gg, betag, mg, vg = bn_params(keys[11], keys[12], keys[13], keys[14], oup)

    wl_f, bl_f = fold_bn(wl, gl, betal, ml, vl)   # local_embedding
    wa_f, ba_f = fold_bn(wa, ga, betaa, ma, va)   # global_act
    wg_f, bg_f = fold_bn(wg, gg, betag, mg, vg)   # global_embedding

    x_l = jax.random.normal(keys[15], (B, Cin, H, W), jnp.float32)
    x_g = jax.random.normal(keys[16], (B, Cin, Hg, Wg), jnp.float32)

    # Resize matrix built once, host-side, outside the jitted call.
    mt_bd = jnp.asarray(build_resize_matrix(H, W, Hg, Wg, B))

    run = jax.jit(injection_pallas)
    out = run(x_l, x_g, wl_f, bl_f, wa_f, ba_f, wg_f, bg_f, mt_bd)
    out = jax.block_until_ready(out)

    ref = injection_reference(x_l, x_g, wl_f, bl_f, wa_f, ba_f, wg_f, bg_f)
    assert out.shape == (B, oup, H, W)
    max_err = float(jnp.max(jnp.abs(out - ref)))
    # bf16 MXU operands with f32 accumulation -> loosened tolerance vs f32 reference
    assert jnp.allclose(out, ref, rtol=5e-2, atol=1e-1), \
        f"mismatch vs reference, max_abs_err={max_err}"

    print("KERNEL_OK")
</pallas_src>

<mosaic_0001>
module attributes {stable_mosaic.version = 11 : i64} {
  func.func @injection_kernel(%arg0: memref<8x512xbf16, #tpu.memory_space<vmem>>, %arg1: memref<8x128xbf16, #tpu.memory_space<vmem>>, %arg2: memref<16x8xbf16, #tpu.memory_space<vmem>>, %arg3: memref<16x1xf32, #tpu.memory_space<vmem>>, %arg4: memref<32x8xbf16, #tpu.memory_space<vmem>>, %arg5: memref<32x1xf32, #tpu.memory_space<vmem>>, %arg6: memref<128x512xbf16, #tpu.memory_space<vmem>>, %arg7: memref<16x512xf32, #tpu.memory_space<vmem>>) attributes {dimension_semantics = [], scalar_prefetch = 0 : i64, scratch_operands = 0 : i64, tpu.core_type = #tpu.core_type<tc>} {
    %c0 = arith.constant 0 : index
    %c0_0 = arith.constant 0 : index
    %0 = vector.load %arg2[%c0, %c0_0] : memref<16x8xbf16, #tpu.memory_space<vmem>>, vector<16x8xbf16>
    %c0_1 = arith.constant 0 : index
    %c0_2 = arith.constant 0 : index
    %1 = vector.load %arg0[%c0_1, %c0_2] : memref<8x512xbf16, #tpu.memory_space<vmem>>, vector<8x512xbf16>
    %cst = arith.constant dense<0.000000e+00> : vector<16x512xf32>
    %2 = tpu.matmul %0, %1, %cst {dimension_numbers = #tpu.dot_dimension_numbers<[1], [0], [0], [1], [0, 0, 1, 1], [], []>} : vector<16x8xbf16>, vector<8x512xbf16>, vector<16x512xf32> -> vector<16x512xf32>
    %c0_3 = arith.constant 0 : index
    %c0_4 = arith.constant 0 : index
    %3 = vector.load %arg3[%c0_3, %c0_4] : memref<16x1xf32, #tpu.memory_space<vmem>>, vector<16x1xf32>
    %4 = vector.broadcast %3 : vector<16x1xf32> to vector<16x512xf32>
    %5 = arith.addf %2, %4 : vector<16x512xf32>
    %cst_5 = arith.constant 0.000000e+00 : f32
    %6 = vector.broadcast %cst_5 : f32 to vector<16x512xf32>
    %7 = arith.maximumf %5, %6 : vector<16x512xf32>
    %c0_6 = arith.constant 0 : index
    %c0_7 = arith.constant 0 : index
    %8 = vector.load %arg4[%c0_6, %c0_7] : memref<32x8xbf16, #tpu.memory_space<vmem>>, vector<32x8xbf16>
    %c0_8 = arith.constant 0 : index
    %c0_9 = arith.constant 0 : index
    %9 = vector.load %arg1[%c0_8, %c0_9] : memref<8x128xbf16, #tpu.memory_space<vmem>>, vector<8x128xbf16>
    %cst_10 = arith.constant dense<0.000000e+00> : vector<32x128xf32>
    %10 = tpu.matmul %8, %9, %cst_10 {dimension_numbers = #tpu.dot_dimension_numbers<[1], [0], [0], [1], [0, 0, 1, 1], [], []>} : vector<32x8xbf16>, vector<8x128xbf16>, vector<32x128xf32> -> vector<32x128xf32>
    %c0_11 = arith.constant 0 : index
    %c0_12 = arith.constant 0 : index
    %11 = vector.load %arg5[%c0_11, %c0_12] : memref<32x1xf32, #tpu.memory_space<vmem>>, vector<32x1xf32>
    %12 = vector.broadcast %11 : vector<32x1xf32> to vector<32x128xf32>
    %13 = arith.addf %10, %12 : vector<32x128xf32>
    %14 = tpu.iota {dimensions = array<i32: 0>} : vector<32x128xi32>
    %cst_13 = arith.constant 3.000000e+00 : f32
    %15 = vector.broadcast %cst_13 : f32 to vector<32x128xf32>
    %16 = arith.addf %13, %15 : vector<32x128xf32>
    %cst_14 = arith.constant 0.000000e+00 : f32
    %cst_15 = arith.constant 6.000000e+00 : f32
    %17 = vector.broadcast %cst_14 : f32 to vector<32x128xf32>
    %18 = arith.maximumf %17, %16 : vector<32x128xf32>
    %19 = vector.broadcast %cst_15 : f32 to vector<32x128xf32>
    %20 = arith.minimumf %19, %18 : vector<32x128xf32>
    %cst_16 = arith.constant 0.166666672 : f32
    %21 = vector.broadcast %cst_16 : f32 to vector<32x128xf32>
    %22 = arith.mulf %20, %21 : vector<32x128xf32>
    %cst_17 = arith.constant 0.000000e+00 : f32
    %23 = vector.broadcast %cst_17 : f32 to vector<32x128xf32>
    %24 = arith.maximumf %13, %23 : vector<32x128xf32>
    %c16_i32 = arith.constant 16 : i32
    %25 = vector.broadcast %c16_i32 : i32 to vector<32x128xi32>
    %26 = arith.cmpi slt, %14, %25 : vector<32x128xi32>
    %27 = arith.select %26, %22, %24 : vector<32x128xi1>, vector<32x128xf32>
    %28 = arith.truncf %27 : vector<32x128xf32> to vector<32x128xbf16>
    %c0_18 = arith.constant 0 : index
    %c0_19 = arith.constant 0 : index
    %29 = vector.load %arg6[%c0_18, %c0_19] : memref<128x512xbf16, #tpu.memory_space<vmem>>, vector<128x512xbf16>
    %cst_20 = arith.constant dense<0.000000e+00> : vector<32x512xf32>
    %30 = tpu.matmul %28, %29, %cst_20 {dimension_numbers = #tpu.dot_dimension_numbers<[1], [0], [0], [1], [0, 0, 1, 1], [], []>} : vector<32x128xbf16>, vector<128x512xbf16>, vector<32x512xf32> -> vector<32x512xf32>
    %31 = vector.extract_strided_slice %30 {offsets = [0, 0], sizes = [16, 512], strides = [1, 1]} : vector<32x512xf32> to vector<16x512xf32>
    %32 = arith.mulf %7, %31 : vector<16x512xf32>
    %33 = vector.extract_strided_slice %30 {offsets = [16, 0], sizes = [16, 512], strides = [1, 1]} : vector<32x512xf32> to vector<16x512xf32>
    %34 = arith.addf %32, %33 : vector<16x512xf32>
    %c0_21 = arith.constant 0 : index
    %c0_22 = arith.constant 0 : index
    %35 = vector.load %arg7[%c0_21, %c0_22] : memref<16x512xf32, #tpu.memory_space<vmem>>, vector<16x512xf32>
    tpu.vector_store %arg7[%c0_21, %c0_22], %34 {strides = array<i32>} : memref<16x512xf32, #tpu.memory_space<vmem>>, vector<16x512xf32>,
    return
  }
}

</mosaic_0001>

<bundles_post_ra>
// kernel: injection_pallas.1
= control target key start
LH: loop header
LB: loop body
LE: loop exit
PB: predicated region body
PF: predicated region fallthrough
CT: control target
= control target key end

     0   :  { %v722_v1 = vmov 0   ;;  %vm62_vm0 = vcmask 1043456   ;;  %vm58_vm1 = vcmask 64512   ;;  %s1032_s0 = inlined_call_operand.vmem [shape: bf16[8,512], index: 0, kind: input, shape index: {}]   ;;  %s1033_s1 = inlined_call_operand.vmem [shape: bf16[8,128], index: 1, kind: input, shape index: {}]   ;;  %s1034_s5 = inlined_call_operand.vmem [shape: f32[32,1], index: 5, kind: input, shape index: {}]   ;;  %s1035_s2 = inlined_call_operand.vmem [shape: bf16[16,8], index: 2, kind: input, shape index: {}]   ;;  %s1036_s3 = inlined_call_operand.vmem [shape: f32[16,1], index: 3, kind: input, shape index: {}]   ;;  %s1037_s4 = inlined_call_operand.vmem [shape: bf16[32,8], index: 4, kind: input, shape index: {}]   ;;  %s1038_s6 = inlined_call_operand.vmem [shape: bf16[128,512], index: 6, kind: input, shape index: {}]   ;;  %s1039_s7 = inlined_call_operand.vmem [shape: f32[16,512], index: 7, kind: output, shape index: {}]  }
   0x1   :  { %v29_v0 = vld [vmem:[%s1032_s0] sm:$0xff]  ;;  %719 = vset.pattern.permute.xlu0 %v722_v1  ;;  %721 = vset.pattern.permute.xlu2 %v722_v1  ;;  %v145_v9 = vld [vmem:[%s1034_s5 + $0x8] sm:$0xff]  ;;  %v146_v11 = vld [vmem:[%s1034_s5 + $0x10] sm:$0xff] }
   0x2   :  { %v50_v2 = vunpack.c.l.b16 %v29_v0  ;;  %v143_v3 = vld [vmem:[%s1033_s1] sm:$0xf]  ;;  %720 = vset.pattern.permute.xlu1 %v722_v1  ;;  %v32_v12 = vld [vmem:[%s1036_s3 + $0x8] sm:$0xff]  ;;  %v147_v13 = vld [vmem:[%s1034_s5 + $0x18] sm:$0xff]  ;;  %v51_v17 = vunpack.c.h.b16 %v29_v0 }
   0x3   :  { %v144_v4 = vld [vmem:[%s1034_s5] sm:$0xff]  ;;  %v185_v6 = vsel %vm62_vm0, %v143_v3, 0  ;;  %160 = vperm.xlu1 %720, %v146_v11   ;;  %v685_v15 = vld [vmem:[%s1037_s4 + $0x8] sm:$0xff]  ;;  %v716_v24 = vld [vmem:[%s1038_s6 + $0xec] sm:$0xf0] }
   0x4   :  { %150 = vperm.xlu0 %719, %v144_v4   ;;  %v54_v5 = vpack.c.b16 %v50_v2, %v50_v2  ;;  %v777_v8 = vld [vmem:[%s1035_s2] sm:$0xff]  ;;  %v30_v16 = vld [vmem:[%s1032_s0 + $0x8] sm:$0xff]  ;;  %v55_v20 = vpack.c.b16 %v51_v17, %v51_v17  ;;  %v671_v30 = vld [vmem:[%s1038_s6 + $0xf0] sm:$0xf0] }
   0x5   :  { %v31_v10 = vld [vmem:[%s1036_s3] sm:$0xff]  ;;  %v52_v18 = vunpack.c.l.b16 %v30_v16  ;;  %v53_v19 = vunpack.c.h.b16 %v30_v16  ;;  %v677_v32 = vld [vmem:[%s1038_s6 + $0xe8] sm:$0xf]  ;;  %v717_v33 = vld [vmem:[%s1038_s6 + $0xf4] sm:$0xf0] }
   0x6   :  { %v64_v7 = vsel %vm62_vm0, %v54_v5, 0  ;;  %35 = vperm.xlu2 %721, %v31_v10   ;;  %v684_v14 = vld [vmem:[%s1037_s4] sm:$0xff]  ;;  %v67_v26 = vsel %vm62_vm0, %v55_v20, 0  ;;  %v715_v34 = vld [vmem:[%s1038_s6 + $0xec] sm:$0xf]  ;;  %v678_v35 = vor.u32 %v717_v33, %v677_v32 }
   0x7   :  { %82 = vmatpush.bf16.msra.mxu0 %v64_v7  ;;  %v56_v21 = vpack.c.b16 %v52_v18, %v52_v18  ;;  %v57_v22 = vpack.c.b16 %v53_v19, %v53_v19  ;;  %v669_v23 = vld [vmem:[%s1038_s6 + $0xe0] sm:$0xf]  ;;  %v714_v25 = vld [vmem:[%s1038_s6 + $0xe4] sm:$0xf]  ;;  %96 = vmatpush.bf16.msra.mxu1 %v67_v26  ;;  %v679_v36 = vld [vmem:[%s1038_s6 + $0xf8] sm:$0xf0] }
   0x8   :  { %v670_v29 = vor.u32 %v716_v24, %v669_v23  ;;  %v674_v31 = vor.u32 %v714_v25, %v671_v30  ;;  %v682_v37 = vor.u32 %v715_v34, %v679_v36  ;;  %v653_v38 = vld [vmem:[%s1038_s6 + $0xc0] sm:$0xf]  ;;  %v712_v39 = vld [vmem:[%s1038_s6 + $0xcc] sm:$0xf0]  ;;  %v710_v40 = vld [vmem:[%s1038_s6 + $0xc4] sm:$0xf] }
   0x9   :  { %v70_v27 = vsel %vm62_vm0, %v56_v21, 0  ;;  %v73_v28 = vsel %vm62_vm0, %v57_v22, 0  ;;  %v654_v41 = vor.u32 %v712_v39, %v653_v38  ;;  %v655_v42 = vld [vmem:[%s1038_s6 + $0xd0] sm:$0xf0]  ;;  %v661_v43 = vld [vmem:[%s1038_s6 + $0xc8] sm:$0xf] }
   0xa   :  { %541 = vmatmul.msk.bf16.vlgmr.msra.gmra.mxu0 %vm58_vm1, %v777_v8  ;;  %110 = vmatpush.bf16.msra.mxu2 %v70_v27  ;;  %v713_v44 = vld [vmem:[%s1038_s6 + $0xd4] sm:$0xf0]  ;;  %v658_v45 = vor.u32 %v710_v40, %v655_v42  ;;  %v711_v47 = vld [vmem:[%s1038_s6 + $0xcc] sm:$0xf]  ;;  %v663_v48 = vld [vmem:[%s1038_s6 + $0xd8] sm:$0xf0] }
   0xb   :  { %194 = vmatpush.bf16.msrb.mxu0 %v185_v6  ;;  %165 = vperm.xlu1 %720, %v147_v13   ;;  %v662_v46 = vor.u32 %v713_v44, %v661_v43  ;;  %v666_v49 = vor.u32 %v711_v47, %v663_v48  ;;  %v637_v50 = vld [vmem:[%s1038_s6 + $0xa0] sm:$0xf]  ;;  %v708_v51 = vld [vmem:[%s1038_s6 + $0xac] sm:$0xf0]  ;;  %v706_v52 = vld [vmem:[%s1038_s6 + $0xa4] sm:$0xf] }
   0xc   :  { %155 = vperm.xlu0 %719, %v145_v9   ;;  %124 = vmatpush.bf16.msra.mxu3 %v73_v28  ;;  %v638_v53 = vor.u32 %v708_v51, %v637_v50  ;;  %v639_v54 = vld [vmem:[%s1038_s6 + $0xb0] sm:$0xf0]  ;;  %v645_v55 = vld [vmem:[%s1038_s6 + $0xa8] sm:$0xf]  ;;  %v709_v56 = vld [vmem:[%s1038_s6 + $0xb4] sm:$0xf0] }
   0xd   :  { %433 = vmatpush.bf16.msrb.mxu1 %v670_v29  ;;  %543 = vmatmul.msk.bf16.vlgmr.msra.gmra.mxu2 %vm58_vm1, %v777_v8  ;;  %v642_v57 = vor.u32 %v706_v52, %v639_v54  ;;  %v646_v58 = vor.u32 %v709_v56, %v645_v55  ;;  %v707_v59 = vld [vmem:[%s1038_s6 + $0xac] sm:$0xf]  ;;  %v647_v60 = vld [vmem:[%s1038_s6 + $0xb8] sm:$0xf0]  ;;  %v621_v62 = vld [vmem:[%s1038_s6 + $0x80] sm:$0xf] }
   0xe   :  { %40 = vperm.xlu2 %721, %v32_v12   ;;  %452 = vmatpush.bf16.msrb.mxu2 %v674_v31  ;;  %v650_v61 = vor.u32 %v707_v59, %v647_v60  ;;  %v704_v63 = vld [vmem:[%s1038_s6 + $0x8c] sm:$0xf0]  ;;  %v702_v0 = vld [vmem:[%s1038_s6 + $0x84] sm:$0xf]  ;;  %v623_v2 = vld [vmem:[%s1038_s6 + $0x90] sm:$0xf0] }
   0xf   :  { %490 = vmatpush.bf16.msra.mxu0 %v682_v37  ;;  %544 = vmatmul.msk.bf16.vlgmr.msra.gmra.mxu3 %vm58_vm1, %v777_v8  ;;  %v622_v1 = vor.u32 %v704_v63, %v621_v62  ;;  %v629_v3 = vld [vmem:[%s1038_s6 + $0x88] sm:$0xf]  ;;  %v705_v4 = vld [vmem:[%s1038_s6 + $0x94] sm:$0xf0]  ;;  %v626_v5 = vor.u32 %v702_v0, %v623_v2  ;;  %v703_v7 = vld [vmem:[%s1038_s6 + $0x8c] sm:$0xf] }
  0x10   :  { %471 = vmatpush.bf16.msrb.mxu3 %v678_v35  ;;  %542 = vmatmul.msk.bf16.vlgmr.msra.gmra.mxu1 %vm58_vm1, %v777_v8  ;;  %v630_v6 = vor.u32 %v705_v4, %v629_v3  ;;  %v631_v8 = vld [vmem:[%s1038_s6 + $0x98] sm:$0xf0]  ;;  %v605_v10 = vld [vmem:[%s1038_s6 + $0x60] sm:$0xf]  ;;  %v700_v11 = vld [vmem:[%s1038_s6 + $0x6c] sm:$0xf0] }
  0x11   :  { %434 = vmatpush.bf16.msrb.mxu1 %v654_v41  ;;  %v634_v9 = vor.u32 %v703_v7, %v631_v8  ;;  %v698_v12 = vld [vmem:[%s1038_s6 + $0x64] sm:$0xf]  ;;  %v606_v13 = vor.u32 %v700_v11, %v605_v10  ;;  %v701_v16 = vld [vmem:[%s1038_s6 + $0x74] sm:$0xf0]  ;;  %v699_v19 = vld [vmem:[%s1038_s6 + $0x6c] sm:$0xf] }
  0x12   :  { %453 = vmatpush.bf16.msrb.mxu2 %v658_v45  ;;  %v615_v20 = vld [vmem:[%s1038_s6 + $0x78] sm:$0xf0]  ;;  %v589_v22 = vld [vmem:[%s1038_s6 + $0x40] sm:$0xf]  ;;  %v696_v23 = vld [vmem:[%s1038_s6 + $0x4c] sm:$0xf0] }
  0x13   :  { %491 = vmatpush.bf16.msra.mxu0 %v666_v49  ;;  %v618_v21 = vor.u32 %v699_v19, %v615_v20  ;;  %v694_v24 = vld [vmem:[%s1038_s6 + $0x44] sm:$0xf]  ;;  %v590_v25 = vor.u32 %v696_v23, %v589_v22  ;;  %v591_v26 = vld [vmem:[%s1038_s6 + $0x50] sm:$0xf0]  ;;  %v597_v27 = vld [vmem:[%s1038_s6 + $0x48] sm:$0xf] }
  0x14   :  { %472 = vmatpush.bf16.msrb.mxu3 %v662_v46  ;;  %v697_v28 = vld [vmem:[%s1038_s6 + $0x54] sm:$0xf0]  ;;  %v594_v29 = vor.u32 %v694_v24, %v591_v26  ;;  %v695_v31 = vld [vmem:[%s1038_s6 + $0x4c] sm:$0xf]  ;;  %v599_v32 = vld [vmem:[%s1038_s6 + $0x58] sm:$0xf0] }
  0x15   :  { %435 = vmatpush.bf16.msrb.mxu1 %v638_v53  ;;  %v598_v30 = vor.u32 %v697_v28, %v597_v27  ;;  %v602_v33 = vor.u32 %v695_v31, %v599_v32  ;;  %v573_v34 = vld [vmem:[%s1038_s6 + $0x20] sm:$0xf]  ;;  %v692_v35 = vld [vmem:[%s1038_s6 + $0x2c] sm:$0xf0]  ;;  %v690_v36 = vld [vmem:[%s1038_s6 + $0x24] sm:$0xf] }
  0x16   :  { %454 = vmatpush.bf16.msrb.mxu2 %v642_v57  ;;  %v574_v37 = vor.u32 %v692_v35, %v573_v34  ;;  %v575_v38 = vld [vmem:[%s1038_s6 + $0x30] sm:$0xf0]  ;;  %v581_v39 = vld [vmem:[%s1038_s6 + $0x28] sm:$0xf]  ;;  %v693_v40 = vld [vmem:[%s1038_s6 + $0x34] sm:$0xf0] }
  0x17   :  { %492 = vmatpush.bf16.msra.mxu0 %v650_v61  ;;  %v578_v41 = vor.u32 %v690_v36, %v575_v38  ;;  %v582_v42 = vor.u32 %v693_v40, %v581_v39  ;;  %v691_v43 = vld [vmem:[%s1038_s6 + $0x2c] sm:$0xf]  ;;  %v583_v44 = vld [vmem:[%s1038_s6 + $0x38] sm:$0xf0]  ;;  %v557_v46 = vld [vmem:[%s1038_s6] sm:$0xf] }
  0x18   :  { %473 = vmatpush.bf16.msrb.mxu3 %v646_v58  ;;  %v586_v45 = vor.u32 %v691_v43, %v583_v44  ;;  %v688_v47 = vld [vmem:[%s1038_s6 + $0xc] sm:$0xf0]  ;;  %v686_v48 = vld [vmem:[%s1038_s6 + $0x4] sm:$0xf]  ;;  %v559_v51 = vld [vmem:[%s1038_s6 + $0x10] sm:$0xf0] }
  0x19   :  { %436 = vmatpush.bf16.msrb.mxu1 %v622_v1  ;;  %v558_v50 = vor.u32 %v688_v47, %v557_v46  ;;  %v565_v52 = vld [vmem:[%s1038_s6 + $0x8] sm:$0xf]  ;;  %v689_v53 = vld [vmem:[%s1038_s6 + $0x14] sm:$0xf0]  ;;  %v562_v54 = vor.u32 %v686_v48, %v559_v51  ;;  %v687_v56 = vld [vmem:[%s1038_s6 + $0xc] sm:$0xf] }
  0x1a   :  { %553 = vmatmul.msk.bf16.vlgmr.msrb.gmra.mxu0 %vm58_vm1, %v684_v14  ;;  %455 = vmatpush.bf16.msrb.mxu2 %v626_v5  ;;  %v607_v14 = vld [vmem:[%s1038_s6 + $0x70] sm:$0xf0]  ;;  %v566_v55 = vor.u32 %v689_v53, %v565_v52  ;;  %v567_v57 = vld [vmem:[%s1038_s6 + $0x18] sm:$0xf0] }
  0x1b   :  { %493 = vmatpush.bf16.msra.mxu0 %v634_v9  ;;  %v610_v17 = vor.u32 %v698_v12, %v607_v14  ;;  %v570_v58 = vor.u32 %v687_v56, %v567_v57 }
  0x1c   :  { %474 = vmatpush.bf16.msrb.mxu3 %v630_v6 }
  0x1d   :  { %437 = vmatpush.bf16.msrb.mxu1 %v606_v13 }
  0x1e   :  { %456 = vmatpush.bf16.msrb.mxu2 %v610_v17 }
  0x1f   :  { %494 = vmatpush.bf16.msra.mxu0 %v618_v21 }
  0x21   :  { %438 = vmatpush.bf16.msrb.mxu1 %v590_v25 }
  0x22   :  { %457 = vmatpush.bf16.msrb.mxu2 %v594_v29 }
  0x23   :  { %495 = vmatpush.bf16.msra.mxu0 %v602_v33 }
  0x25   :  { %439 = vmatpush.bf16.msrb.mxu1 %v574_v37 }
  0x26   :  { %458 = vmatpush.bf16.msrb.mxu2 %v578_v41 }
  0x27   :  { %496 = vmatpush.bf16.msra.mxu0 %v586_v45 }
  0x29   :  { %440 = vmatpush.bf16.msrb.mxu1 %v558_v50 }
  0x2a   :  { %554 = vmatmul.msk.bf16.gmra.mxu0 %vm58_vm1, %v685_v15  ;;  %v613_v15 = vld [vmem:[%s1038_s6 + $0x68] sm:$0xf]  ;;  %459 = vmatpush.bf16.msrb.mxu2 %v562_v54 }
  0x2b   :  { %v614_v18 = vor.u32 %v701_v16, %v613_v15  ;;  %497 = vmatpush.bf16.msra.mxu0 %v570_v58 }
  0x2d   :  { %475 = vmatpush.bf16.msrb.mxu3 %v614_v18 }
  0x31   :  { %476 = vmatpush.bf16.msrb.mxu3 %v598_v30 }
  0x35   :  { %477 = vmatpush.bf16.msrb.mxu3 %v582_v42 }
  0x39   :  { %478 = vmatpush.bf16.msrb.mxu3 %v566_v55 }
  0x60   :  { %v36_v28 = vpop.permute.xlu2 %35 }
  0x68   :  { %v41_v36 = vpop.permute.xlu2 %40 }
  0x75   :  { %v161_v8 = vpop.permute.xlu1 %160 }
  0x76   :  { %v151_v60 = vpop.permute.xlu0 %150 }
  0x7d   :  { %v166_v14 = vpop.permute.xlu1 %165 }
  0x7e   :  { %v156_v0 = vpop.permute.xlu0 %155 }
  0x87   :  { %v84_v49 = vpop.f32.mrf.mxu0 }
  0x88   :  { %v85_v32 = vadd.f32 %v84_v49, %v36_v28 }
  0x8a   :  { %v131_v35 = vmax.f32 %v85_v32, 0.0 }
  0x8d   :  { %v98_v20 = vpop.f32.mrf.mxu1 }
  0x8e   :  { %v99_v39 = vadd.f32 %v98_v20, %v36_v28 }
  0x8f   :  { %v86_v59 = vpop.f32.mrf.mxu0 }
  0x90   :  { %v112_v21 = vpop.f32.mrf.mxu2  ;;  %v87_v45 = vadd.f32 %v86_v59, %v41_v36  ;;  %v132_v51 = vmax.f32 %v99_v39, 0.0 }
  0x91   :  { %v113_v42 = vadd.f32 %v112_v21, %v36_v28 }
  0x92   :  { %v126_v22 = vpop.f32.mrf.mxu3  ;;  %v135_v52 = vmax.f32 %v87_v45, 0.0 }
  0x93   :  { %v127_v34 = vadd.f32 %v126_v22, %v36_v28  ;;  %v133_v49 = vmax.f32 %v113_v42, 0.0 }
  0x95   :  { %v100_v23 = vpop.f32.mrf.mxu1  ;;  %v134_v37 = vmax.f32 %v127_v34, 0.0 }
  0x96   :  { %v101_v57 = vadd.f32 %v100_v23, %v41_v36 }
  0x97   :  { %v196_v61 = vpop.f32.mrf.mxu0 }
  0x98   :  { %v197_v62 = vadd.f32 %v196_v61, %v151_v60  ;;  %v114_v24 = vpop.f32.mrf.mxu2 }
  0x99   :  { %v115_v61 = vadd.f32 %v114_v24, %v41_v36 }
  0x9a   :  { %v211_v63 = vadd.f32 3.0, %v197_v62  ;;  %v128_v25 = vpop.f32.mrf.mxu3 }
  0x9b   :  { %v129_v48 = vadd.f32 %v128_v25, %v41_v36 }
  0x9c   :  { %v215_v2 = vmax.f32 %v211_v63, 0.0 }
  0x9d   :  { %v138_v54 = vmax.f32 %v129_v48, 0.0 }
  0x9e   :  { %v219_v5 = vmin.f32 %v215_v2, 6.0 }
  0x9f   :  { %v198_v1 = vpop.f32.mrf.mxu0 }
  0xa0   :  { %v199_v3 = vadd.f32 %v198_v1, %v156_v0  ;;  %v223_v10 = vmul.f32 0.16666667, %v219_v5  ;;  %v137_v5 = vmax.f32 %v115_v61, 0.0 }
  0xa2   :  { %v212_v4 = vadd.f32 3.0, %v199_v3 }
  0xa4   :  { %v216_v6 = vmax.f32 %v212_v4, 0.0  ;;  %v136_v4 = vmax.f32 %v101_v57, 0.0 }
  0xa6   :  { %v220_v7 = vmin.f32 %v216_v6, 6.0 }
  0xa7   :  { %v201_v9 = vpop.f32.mrf.mxu0 }
  0xa8   :  { %v224_v11 = vmul.f32 0.16666667, %v220_v7  ;;  %v202_v16 = vadd.f32 %v201_v9, %v161_v8 }
  0xaa   :  { %v239_v12 = vpack.c.bf16 %v224_v11, %v223_v10  ;;  %v229_v18 = vmax.f32 %v202_v16, 0.0 }
  0xac   :  { %441 = vmatmul.bf16.vlgmr.msrb.gmra.mxu1 %v239_v12  ;;  %460 = vmatmul.bf16.vlgmr.msrb.gmra.mxu2 %v239_v12 }
  0xad   :  { %479 = vmatmul.bf16.vlgmr.msrb.gmra.mxu3 %v239_v12  ;;  %498 = vmatmul.bf16.vlgmr.msra.gmra.mxu0 %v239_v12 }
  0xaf   :  { %v203_v13 = vpop.f32.mrf.mxu0 }
  0xb0   :  { %v204_v15 = vadd.f32 %v203_v13, %v166_v14 }
  0xb2   :  { %v230_v17 = vmax.f32 %v204_v15, 0.0 }
  0xb4   :  { %v240_v19 = vpack.c.bf16 %v230_v17, %v229_v18 }
  0xbc   :  { %446 = vmatmul.bf16.gmra.mxu1 %v240_v19  ;;  %465 = vmatmul.bf16.gmra.mxu2 %v240_v19 }
  0xbd   :  { %484 = vmatmul.bf16.gmra.mxu3 %v240_v19  ;;  %503 = vmatmul.bf16.gmra.mxu0 %v240_v19 }
 0x129   :  { %v442_v26 = vpop.f32.mrf.mxu1 }
 0x12a   :  { %v499_v27 = vpop.f32.mrf.mxu0  ;;  %v509_v40 = vmul.f32 %v442_v26, %v131_v35 }
 0x12b   :  { %v512_v43 = vmul.f32 %v499_v27, %v134_v37 }
 0x12f   :  { %v461_v29 = vpop.f32.mrf.mxu2 }
 0x130   :  { %v480_v30 = vpop.f32.mrf.mxu3  ;;  %v510_v53 = vmul.f32 %v461_v29, %v132_v51 }
 0x131   :  { %v444_v31 = vpop.f32.mrf.mxu1  ;;  %v511_v55 = vmul.f32 %v480_v30, %v133_v49 }
 0x132   :  { %v501_v33 = vpop.f32.mrf.mxu0  ;;  %v513_v58 = vmul.f32 %v444_v31, %v135_v52 }
 0x133   :  { %v516_v62 = vmul.f32 %v501_v33, %v138_v54 }
 0x137   :  { %v463_v38 = vpop.f32.mrf.mxu2 }
 0x138   :  { %v482_v41 = vpop.f32.mrf.mxu3  ;;  %v514_v6 = vmul.f32 %v463_v38, %v136_v4 }
 0x139   :  { %v447_v44 = vpop.f32.mrf.mxu1  ;;  %v515_v7 = vmul.f32 %v482_v41, %v137_v5 }
 0x13a   :  { %v517_v46 = vadd.f32 %v509_v40, %v447_v44  ;;  %v504_v47 = vpop.f32.mrf.mxu0 }
 0x13b   :  { %v520_v50 = vadd.f32 %v512_v43, %v504_v47 }
 0x13c   :  { %525 = vst [vmem:[%s1039_s7] sm:$0xff] %v517_v46 }
 0x13d   :  { %528 = vst [vmem:[%s1039_s7 + $0x18] sm:$0xff] %v520_v50 }
 0x13f   :  { %v466_v56 = vpop.f32.mrf.mxu2 }
 0x140   :  { %v518_v59 = vadd.f32 %v510_v53, %v466_v56  ;;  %v485_v60 = vpop.f32.mrf.mxu3 }
 0x141   :  { %v519_v63 = vadd.f32 %v511_v55, %v485_v60  ;;  %v449_v0 = vpop.f32.mrf.mxu1 }
 0x142   :  { %526 = vst [vmem:[%s1039_s7 + $0x8] sm:$0xff] %v518_v59  ;;  %v521_v1 = vadd.f32 %v513_v58, %v449_v0  ;;  %v506_v2 = vpop.f32.mrf.mxu0 }
 0x143   :  { %527 = vst [vmem:[%s1039_s7 + $0x10] sm:$0xff] %v519_v63  ;;  %v524_v3 = vadd.f32 %v516_v62, %v506_v2 }
 0x144   :  { %529 = vst [vmem:[%s1039_s7 + $0x20] sm:$0xff] %v521_v1 }
 0x145   :  { %532 = vst [vmem:[%s1039_s7 + $0x38] sm:$0xff] %v524_v3 }
 0x147   :  { %v468_v8 = vpop.f32.mrf.mxu2 }
 0x148   :  { %v522_v9 = vadd.f32 %v514_v6, %v468_v8  ;;  %v487_v10 = vpop.f32.mrf.mxu3 }
 0x149   :  { %v523_v11 = vadd.f32 %v515_v7, %v487_v10 }
 0x14a   :  { %530 = vst [vmem:[%s1039_s7 + $0x28] sm:$0xff] %v522_v9 }
 0x14b   :  { %531 = vst [vmem:[%s1039_s7 + $0x30] sm:$0xff] %v523_v11 }

</bundles_post_ra>
